<compile_context>
chip_gen: v7x
topology: tpu7x:2x2x1
jax: 0.10.0
libtpu: 0.0.40
codegen_flags: <defaults>
</compile_context>

<pallas_src>
import functools

import jax
import jax.numpy as jnp
from jax.experimental import pallas as pl
from jax.experimental.pallas import tpu as pltpu


# -----------------------------------------------------------------------------
# Fused kernel: student+teacher forward (one packed matmul) + online KL loss.
# Grid = (batch_tiles, class_tiles); class axis is the KL reduction axis.
# -----------------------------------------------------------------------------
def _fused_distill_kernel(x_ref, w_ref, b_ref, s_out_ref, kl_out_ref,
                          m_s, z_s, m_t, z_t, a_t, *, tn, inv_temp):
    j = pl.program_id(1)

    @pl.when(j == 0)
    def _():
        m_s[...] = jnp.full_like(m_s, -jnp.inf)
        m_t[...] = jnp.full_like(m_t, -jnp.inf)
        z_s[...] = jnp.zeros_like(z_s)
        z_t[...] = jnp.zeros_like(z_t)
        a_t[...] = jnp.zeros_like(a_t)

    # One lane-dense MXU matmul covering student + teacher columns of this tile:
    # [tm, H] (bf16) @ [H, 2*tn] (bf16) -> f32 accumulate.
    logits = jnp.dot(x_ref[...], w_ref[...],
                     preferred_element_type=jnp.float32) + b_ref[...]
    s = logits[:, :tn]            # student logits tile (written to HBM)
    t = logits[:, tn:2 * tn]      # teacher logits tile (stays in VMEM only)

    s_out_ref[...] = s.astype(s_out_ref.dtype)

    s_div = s * inv_temp
    t_div = t * inv_temp

    # Online logsumexp for the student.
    m_s_new = jnp.maximum(m_s[...], jnp.max(s_div, axis=-1, keepdims=True))
    z_s[...] = (z_s[...] * jnp.exp(m_s[...] - m_s_new)
                + jnp.sum(jnp.exp(s_div - m_s_new), axis=-1, keepdims=True))
    m_s[...] = m_s_new

    # Online logsumexp for the teacher + online sum_c exp(t_c - m_t)*(t_c - s_c).
    m_t_new = jnp.maximum(m_t[...], jnp.max(t_div, axis=-1, keepdims=True))
    scale_t = jnp.exp(m_t[...] - m_t_new)
    p_un = jnp.exp(t_div - m_t_new)
    z_t[...] = z_t[...] * scale_t + jnp.sum(p_un, axis=-1, keepdims=True)
    a_t[...] = (a_t[...] * scale_t
                + jnp.sum(p_un * (t_div - s_div), axis=-1, keepdims=True))
    m_t[...] = m_t_new

    @pl.when(j == pl.num_programs(1) - 1)
    def _():
        # Per-row KL(p_t || q_s) at temperature T:
        #   sum_c p_c * (t_c/T - s_c/T) - lse(t/T) + lse(s/T)
        s_lse = m_s[...] + jnp.log(z_s[...])
        t_lse = m_t[...] + jnp.log(z_t[...])
        kl_row = a_t[...] / z_t[...] - t_lse + s_lse
        kl_out_ref[...] = kl_row.astype(kl_out_ref.dtype)


# -----------------------------------------------------------------------------
# Wrapper: forward (training mode) + compute_loss fused into one pallas_call.
# Returns (student_logits, total_loss).
# -----------------------------------------------------------------------------
def distillation_forward_and_loss(x, w_student, b_student, w_teacher, b_teacher,
                                  student_loss, *, alpha_student=1.0,
                                  ce_alpha=0.5, ce_temperature=2.0,
                                  tm=None, tn=None, logits_dtype=jnp.float32):
    B, H = x.shape
    C = w_student.shape[1]

    # Tile sizes: full dims at toy scale, 256 x 512 style tiles at real scale.
    if tm is None:
        tm = B if B <= 256 else 256
    if tn is None:
        tn = C if C <= 512 else 512
    assert B % tm == 0 and (tm % 8 == 0 or tm == B), "bad batch tile"
    assert C % tn == 0 and (tn % 128 == 0 or tn == C), "bad class tile"
    nbt, nct = B // tm, C // tn

    # Pack weights so column-block j of w_packed = [Ws[:, jtile] | Wt[:, jtile]]:
    # one wide matmul per class tile instead of two narrow ones.
    wdt = x.dtype
    ws_r = w_student.astype(wdt).reshape(H, nct, tn)
    wt_r = w_teacher.astype(wdt).reshape(H, nct, tn)
    w_packed = jnp.concatenate([ws_r, wt_r], axis=2).reshape(H, nct * 2 * tn)
    b_packed = jnp.concatenate(
        [b_student.astype(jnp.float32).reshape(nct, tn),
         b_teacher.astype(jnp.float32).reshape(nct, tn)], axis=1,
    ).reshape(1, nct * 2 * tn)

    kernel = functools.partial(_fused_distill_kernel, tn=tn,
                               inv_temp=1.0 / float(ce_temperature))

    student_logits, kl_rows = pl.pallas_call(
        kernel,
        out_shape=(
            jax.ShapeDtypeStruct((B, C), logits_dtype),   # student logits
            jax.ShapeDtypeStruct((B, 1), jnp.float32),    # per-row KL partials
        ),
        grid_spec=pltpu.PrefetchScalarGridSpec(
            num_scalar_prefetch=0,
            grid=(nbt, nct),
            in_specs=[
                pl.BlockSpec((tm, H), lambda i, j: (i, 0)),        # x
                pl.BlockSpec((H, 2 * tn), lambda i, j: (0, j)),    # packed W
                pl.BlockSpec((1, 2 * tn), lambda i, j: (0, j)),    # packed b
            ],
            out_specs=(
                pl.BlockSpec((tm, tn), lambda i, j: (i, j)),       # student logits
                pl.BlockSpec((tm, 1), lambda i, j: (i, 0)),        # KL rows
            ),
            scratch_shapes=[pltpu.VMEM((tm, 1), jnp.float32)] * 5,  # m_s z_s m_t z_t a_t
        ),
        compiler_params=pltpu.CompilerParams(
            dimension_semantics=("parallel", "arbitrary"),
            vmem_limit_bytes=32 * 1024 * 1024,
        ),
    )(x, w_packed, b_packed)

    # Tiny scalar epilogue (== DistillationModelWrapper.compute_loss combine).
    kd_loss = ce_alpha * (ce_temperature ** 2) * (jnp.sum(kl_rows) / B)
    loss = alpha_student * student_loss.astype(jnp.float32) + kd_loss
    return student_logits, loss


# -----------------------------------------------------------------------------
# Pure-JAX reference (sanity check)
# -----------------------------------------------------------------------------
def _reference(x, ws, bs, wt, bt, student_loss, *, alpha_student, ce_alpha,
               ce_temperature):
    xf = x.astype(jnp.float32)
    s = xf @ ws.astype(jnp.float32) + bs
    t = xf @ wt.astype(jnp.float32) + bt
    log_q = jax.nn.log_softmax(s / ce_temperature, axis=-1)
    log_p = jax.nn.log_softmax(t / ce_temperature, axis=-1)
    p = jnp.exp(log_p)
    kl = jnp.sum(p * (log_p - log_q)) / x.shape[0]
    loss = alpha_student * student_loss + ce_alpha * kl * ce_temperature ** 2
    return s, loss


if __name__ == "__main__":
    B, H, C = 8, 32, 16                 # batch, hidden, num classes
    alpha_student = 1.0
    ce_alpha = 0.5
    ce_temperature = 2.0

    key = jax.random.PRNGKey(0)
    kx, kws, kbs, kwt, kbt, kl_ = jax.random.split(key, 6)
    x = jax.random.normal(kx, (B, H), dtype=jnp.float32).astype(jnp.bfloat16)
    w_student = (jax.random.normal(kws, (H, C), jnp.float32) * 0.1).astype(jnp.bfloat16)
    b_student = jax.random.normal(kbs, (C,), jnp.float32) * 0.1
    w_teacher = (jax.random.normal(kwt, (H, C), jnp.float32) * 0.1).astype(jnp.bfloat16)
    b_teacher = jax.random.normal(kbt, (C,), jnp.float32) * 0.1
    student_loss = jnp.abs(jax.random.normal(kl_, (), jnp.float32))

    # fused training-mode forward (teacher runs, cached in VMEM) + compute_loss
    student_logits, loss = distillation_forward_and_loss(
        x, w_student, b_student, w_teacher, b_teacher, student_loss,
        alpha_student=alpha_student, ce_alpha=ce_alpha,
        ce_temperature=ce_temperature)
    student_logits = jax.block_until_ready(student_logits)
    loss = jax.block_until_ready(loss)

    # sanity check against pure-JAX reference
    s_ref, loss_ref = _reference(
        x, w_student, b_student, w_teacher, b_teacher, student_loss,
        alpha_student=alpha_student, ce_alpha=ce_alpha,
        ce_temperature=ce_temperature)
    assert jnp.allclose(student_logits, s_ref, rtol=1e-4, atol=1e-4), "logits mismatch"
    assert jnp.allclose(loss, loss_ref, rtol=1e-4, atol=1e-4), "loss mismatch"

    print("KERNEL_OK")
</pallas_src>

<mosaic_0001>
module attributes {stable_mosaic.version = 11 : i64} {
  func.func @_fused_distill_kernel(%arg0: i32, %arg1: i32, %arg2: memref<8x32xbf16, #tpu.memory_space<vmem>>, %arg3: memref<32x32xbf16, #tpu.memory_space<vmem>>, %arg4: memref<1x32xf32, #tpu.memory_space<vmem>>, %arg5: memref<8x16xf32, #tpu.memory_space<vmem>>, %arg6: memref<8x1xf32, #tpu.memory_space<vmem>>, %arg7: memref<8x1xf32, #tpu.memory_space<vmem>>, %arg8: memref<8x1xf32, #tpu.memory_space<vmem>>, %arg9: memref<8x1xf32, #tpu.memory_space<vmem>>, %arg10: memref<8x1xf32, #tpu.memory_space<vmem>>, %arg11: memref<8x1xf32, #tpu.memory_space<vmem>>) attributes {dimension_semantics = [#tpu.dimension_semantics<parallel>, #tpu.dimension_semantics<arbitrary>], iteration_bounds = array<i64: 1, 1>, scalar_prefetch = 0 : i64, scratch_operands = 5 : i64, tpu.core_type = #tpu.core_type<tc>, window_params = [{transform_indices = @transform_0, window_bounds = array<i64: 8, 32>}, {transform_indices = @transform_1, window_bounds = array<i64: 32, 32>}, {transform_indices = @transform_2, window_bounds = array<i64: 1, 32>}, {transform_indices = @transform_3, window_bounds = array<i64: 8, 16>}, {transform_indices = @transform_4, window_bounds = array<i64: 8, 1>}]} {
    %c0_i32 = arith.constant 0 : i32
    %0 = arith.cmpi eq, %arg1, %c0_i32 : i32
    %1 = arith.extui %0 : i1 to i32
    %c0_i32_0 = arith.constant 0 : i32
    %2 = arith.cmpi ne, %1, %c0_i32_0 : i32
    scf.if %2 {
      %cst_41 = arith.constant 0xFF800000 : f32
      %61 = vector.broadcast %cst_41 : f32 to vector<8x1xf32>
      %c0_42 = arith.constant 0 : index
      %c0_43 = arith.constant 0 : index
      %62 = vector.load %arg7[%c0_42, %c0_43] : memref<8x1xf32, #tpu.memory_space<vmem>>, vector<8x1xf32>
      tpu.vector_store %arg7[%c0_42, %c0_43], %61 {strides = array<i32>} : memref<8x1xf32, #tpu.memory_space<vmem>>, vector<8x1xf32>,
      %cst_44 = arith.constant 0xFF800000 : f32
      %63 = vector.broadcast %cst_44 : f32 to vector<8x1xf32>
      %c0_45 = arith.constant 0 : index
      %c0_46 = arith.constant 0 : index
      %64 = vector.load %arg9[%c0_45, %c0_46] : memref<8x1xf32, #tpu.memory_space<vmem>>, vector<8x1xf32>
      tpu.vector_store %arg9[%c0_45, %c0_46], %63 {strides = array<i32>} : memref<8x1xf32, #tpu.memory_space<vmem>>, vector<8x1xf32>,
      %cst_47 = arith.constant 0.000000e+00 : f32
      %65 = vector.broadcast %cst_47 : f32 to vector<8x1xf32>
      %c0_48 = arith.constant 0 : index
      %c0_49 = arith.constant 0 : index
      %66 = vector.load %arg8[%c0_48, %c0_49] : memref<8x1xf32, #tpu.memory_space<vmem>>, vector<8x1xf32>
      tpu.vector_store %arg8[%c0_48, %c0_49], %65 {strides = array<i32>} : memref<8x1xf32, #tpu.memory_space<vmem>>, vector<8x1xf32>,
      %cst_50 = arith.constant 0.000000e+00 : f32
      %67 = vector.broadcast %cst_50 : f32 to vector<8x1xf32>
      %c0_51 = arith.constant 0 : index
      %c0_52 = arith.constant 0 : index
      %68 = vector.load %arg10[%c0_51, %c0_52] : memref<8x1xf32, #tpu.memory_space<vmem>>, vector<8x1xf32>
      tpu.vector_store %arg10[%c0_51, %c0_52], %67 {strides = array<i32>} : memref<8x1xf32, #tpu.memory_space<vmem>>, vector<8x1xf32>,
      %cst_53 = arith.constant 0.000000e+00 : f32
      %69 = vector.broadcast %cst_53 : f32 to vector<8x1xf32>
      %c0_54 = arith.constant 0 : index
      %c0_55 = arith.constant 0 : index
      %70 = vector.load %arg11[%c0_54, %c0_55] : memref<8x1xf32, #tpu.memory_space<vmem>>, vector<8x1xf32>
      tpu.vector_store %arg11[%c0_54, %c0_55], %69 {strides = array<i32>} : memref<8x1xf32, #tpu.memory_space<vmem>>, vector<8x1xf32>,
    } else {
    }
    %c0 = arith.constant 0 : index
    %c0_1 = arith.constant 0 : index
    %3 = vector.load %arg2[%c0, %c0_1] : memref<8x32xbf16, #tpu.memory_space<vmem>>, vector<8x32xbf16>
    %c0_2 = arith.constant 0 : index
    %c0_3 = arith.constant 0 : index
    %4 = vector.load %arg3[%c0_2, %c0_3] : memref<32x32xbf16, #tpu.memory_space<vmem>>, vector<32x32xbf16>
    %cst = arith.constant dense<0.000000e+00> : vector<8x32xf32>
    %5 = tpu.matmul %3, %4, %cst {dimension_numbers = #tpu.dot_dimension_numbers<[1], [0], [0], [1], [0, 0, 1, 1], [], []>} : vector<8x32xbf16>, vector<32x32xbf16>, vector<8x32xf32> -> vector<8x32xf32>
    %c0_4 = arith.constant 0 : index
    %c0_5 = arith.constant 0 : index
    %6 = vector.load %arg4[%c0_4, %c0_5] : memref<1x32xf32, #tpu.memory_space<vmem>>, vector<1x32xf32>
    %7 = vector.broadcast %6 : vector<1x32xf32> to vector<8x32xf32>
    %8 = arith.addf %5, %7 : vector<8x32xf32>
    %9 = vector.extract_strided_slice %8 {offsets = [0, 0], sizes = [8, 16], strides = [1, 1]} : vector<8x32xf32> to vector<8x16xf32>
    %10 = vector.extract_strided_slice %8 {offsets = [0, 16], sizes = [8, 16], strides = [1, 1]} : vector<8x32xf32> to vector<8x16xf32>
    %c0_6 = arith.constant 0 : index
    %c0_7 = arith.constant 0 : index
    %11 = vector.load %arg5[%c0_6, %c0_7] : memref<8x16xf32, #tpu.memory_space<vmem>>, vector<8x16xf32>
    tpu.vector_store %arg5[%c0_6, %c0_7], %9 {strides = array<i32>} : memref<8x16xf32, #tpu.memory_space<vmem>>, vector<8x16xf32>,
    %cst_8 = arith.constant 5.000000e-01 : f32
    %12 = vector.broadcast %cst_8 : f32 to vector<8x16xf32>
    %13 = arith.mulf %9, %12 : vector<8x16xf32>
    %cst_9 = arith.constant 5.000000e-01 : f32
    %14 = vector.broadcast %cst_9 : f32 to vector<8x16xf32>
    %15 = arith.mulf %10, %14 : vector<8x16xf32>
    %c0_10 = arith.constant 0 : index
    %c0_11 = arith.constant 0 : index
    %16 = vector.load %arg7[%c0_10, %c0_11] : memref<8x1xf32, #tpu.memory_space<vmem>>, vector<8x1xf32>
    %cst_12 = arith.constant dense<0xFF800000> : vector<8xf32>
    %17 = vector.multi_reduction <maximumf>, %13, %cst_12 [1] : vector<8x16xf32> to vector<8xf32>
    %18 = vector.shape_cast %17 : vector<8xf32> to vector<8x1xf32>
    %19 = arith.maximumf %16, %18 : vector<8x1xf32>
    %c0_13 = arith.constant 0 : index
    %c0_14 = arith.constant 0 : index
    %20 = vector.load %arg8[%c0_13, %c0_14] : memref<8x1xf32, #tpu.memory_space<vmem>>, vector<8x1xf32>
    %c0_15 = arith.constant 0 : index
    %c0_16 = arith.constant 0 : index
    %21 = vector.load %arg7[%c0_15, %c0_16] : memref<8x1xf32, #tpu.memory_space<vmem>>, vector<8x1xf32>
    %22 = arith.subf %21, %19 : vector<8x1xf32>
    %23 = math.exp %22 : vector<8x1xf32>
    %24 = arith.mulf %20, %23 : vector<8x1xf32>
    %25 = vector.broadcast %19 : vector<8x1xf32> to vector<8x16xf32>
    %26 = arith.subf %13, %25 : vector<8x16xf32>
    %27 = math.exp %26 : vector<8x16xf32>
    %cst_17 = arith.constant dense<0.000000e+00> : vector<8xf32>
    %28 = vector.multi_reduction <add>, %27, %cst_17 [1] : vector<8x16xf32> to vector<8xf32>
    %29 = vector.shape_cast %28 : vector<8xf32> to vector<8x1xf32>
    %30 = arith.addf %24, %29 : vector<8x1xf32>
    %c0_18 = arith.constant 0 : index
    %c0_19 = arith.constant 0 : index
    %31 = vector.load %arg8[%c0_18, %c0_19] : memref<8x1xf32, #tpu.memory_space<vmem>>, vector<8x1xf32>
    tpu.vector_store %arg8[%c0_18, %c0_19], %30 {strides = array<i32>} : memref<8x1xf32, #tpu.memory_space<vmem>>, vector<8x1xf32>,
    %c0_20 = arith.constant 0 : index
    %c0_21 = arith.constant 0 : index
    %32 = vector.load %arg7[%c0_20, %c0_21] : memref<8x1xf32, #tpu.memory_space<vmem>>, vector<8x1xf32>
    tpu.vector_store %arg7[%c0_20, %c0_21], %19 {strides = array<i32>} : memref<8x1xf32, #tpu.memory_space<vmem>>, vector<8x1xf32>,
    %c0_22 = arith.constant 0 : index
    %c0_23 = arith.constant 0 : index
    %33 = vector.load %arg9[%c0_22, %c0_23] : memref<8x1xf32, #tpu.memory_space<vmem>>, vector<8x1xf32>
    %cst_24 = arith.constant dense<0xFF800000> : vector<8xf32>
    %34 = vector.multi_reduction <maximumf>, %15, %cst_24 [1] : vector<8x16xf32> to vector<8xf32>
    %35 = vector.shape_cast %34 : vector<8xf32> to vector<8x1xf32>
    %36 = arith.maximumf %33, %35 : vector<8x1xf32>
    %c0_25 = arith.constant 0 : index
    %c0_26 = arith.constant 0 : index
    %37 = vector.load %arg9[%c0_25, %c0_26] : memref<8x1xf32, #tpu.memory_space<vmem>>, vector<8x1xf32>
    %38 = arith.subf %37, %36 : vector<8x1xf32>
    %39 = math.exp %38 : vector<8x1xf32>
    %40 = vector.broadcast %36 : vector<8x1xf32> to vector<8x16xf32>
    %41 = arith.subf %15, %40 : vector<8x16xf32>
    %42 = math.exp %41 : vector<8x16xf32>
    %c0_27 = arith.constant 0 : index
    %c0_28 = arith.constant 0 : index
    %43 = vector.load %arg10[%c0_27, %c0_28] : memref<8x1xf32, #tpu.memory_space<vmem>>, vector<8x1xf32>
    %44 = arith.mulf %43, %39 : vector<8x1xf32>
    %cst_29 = arith.constant dense<0.000000e+00> : vector<8xf32>
    %45 = vector.multi_reduction <add>, %42, %cst_29 [1] : vector<8x16xf32> to vector<8xf32>
    %46 = vector.shape_cast %45 : vector<8xf32> to vector<8x1xf32>
    %47 = arith.addf %44, %46 : vector<8x1xf32>
    %c0_30 = arith.constant 0 : index
    %c0_31 = arith.constant 0 : index
    %48 = vector.load %arg10[%c0_30, %c0_31] : memref<8x1xf32, #tpu.memory_space<vmem>>, vector<8x1xf32>
    tpu.vector_store %arg10[%c0_30, %c0_31], %47 {strides = array<i32>} : memref<8x1xf32, #tpu.memory_space<vmem>>, vector<8x1xf32>,
    %c0_32 = arith.constant 0 : index
    %c0_33 = arith.constant 0 : index
    %49 = vector.load %arg11[%c0_32, %c0_33] : memref<8x1xf32, #tpu.memory_space<vmem>>, vector<8x1xf32>
    %50 = arith.mulf %49, %39 : vector<8x1xf32>
    %51 = arith.subf %15, %13 : vector<8x16xf32>
    %52 = arith.mulf %42, %51 : vector<8x16xf32>
    %cst_34 = arith.constant dense<0.000000e+00> : vector<8xf32>
    %53 = vector.multi_reduction <add>, %52, %cst_34 [1] : vector<8x16xf32> to vector<8xf32>
    %54 = vector.shape_cast %53 : vector<8xf32> to vector<8x1xf32>
    %55 = arith.addf %50, %54 : vector<8x1xf32>
    %c0_35 = arith.constant 0 : index
    %c0_36 = arith.constant 0 : index
    %56 = vector.load %arg11[%c0_35, %c0_36] : memref<8x1xf32, #tpu.memory_space<vmem>>, vector<8x1xf32>
    tpu.vector_store %arg11[%c0_35, %c0_36], %55 {strides = array<i32>} : memref<8x1xf32, #tpu.memory_space<vmem>>, vector<8x1xf32>,
    %c0_37 = arith.constant 0 : index
    %c0_38 = arith.constant 0 : index
    %57 = vector.load %arg9[%c0_37, %c0_38] : memref<8x1xf32, #tpu.memory_space<vmem>>, vector<8x1xf32>
    tpu.vector_store %arg9[%c0_37, %c0_38], %36 {strides = array<i32>} : memref<8x1xf32, #tpu.memory_space<vmem>>, vector<8x1xf32>,
    %c0_i32_39 = arith.constant 0 : i32
    %58 = arith.cmpi eq, %arg1, %c0_i32_39 : i32
    %59 = arith.extui %58 : i1 to i32
    %c0_i32_40 = arith.constant 0 : i32
    %60 = arith.cmpi ne, %59, %c0_i32_40 : i32
    scf.if %60 {
      %c0_41 = arith.constant 0 : index
      %c0_42 = arith.constant 0 : index
      %61 = vector.load %arg7[%c0_41, %c0_42] : memref<8x1xf32, #tpu.memory_space<vmem>>, vector<8x1xf32>
      %c0_43 = arith.constant 0 : index
      %c0_44 = arith.constant 0 : index
      %62 = vector.load %arg8[%c0_43, %c0_44] : memref<8x1xf32, #tpu.memory_space<vmem>>, vector<8x1xf32>
      %63 = math.log %62 : vector<8x1xf32>
      %64 = arith.addf %61, %63 : vector<8x1xf32>
      %c0_45 = arith.constant 0 : index
      %c0_46 = arith.constant 0 : index
      %65 = vector.load %arg9[%c0_45, %c0_46] : memref<8x1xf32, #tpu.memory_space<vmem>>, vector<8x1xf32>
      %c0_47 = arith.constant 0 : index
      %c0_48 = arith.constant 0 : index
      %66 = vector.load %arg10[%c0_47, %c0_48] : memref<8x1xf32, #tpu.memory_space<vmem>>, vector<8x1xf32>
      %67 = math.log %66 : vector<8x1xf32>
      %68 = arith.addf %65, %67 : vector<8x1xf32>
      %c0_49 = arith.constant 0 : index
      %c0_50 = arith.constant 0 : index
      %69 = vector.load %arg11[%c0_49, %c0_50] : memref<8x1xf32, #tpu.memory_space<vmem>>, vector<8x1xf32>
      %c0_51 = arith.constant 0 : index
      %c0_52 = arith.constant 0 : index
      %70 = vector.load %arg10[%c0_51, %c0_52] : memref<8x1xf32, #tpu.memory_space<vmem>>, vector<8x1xf32>
      %71 = arith.divf %69, %70 : vector<8x1xf32>
      %72 = arith.subf %71, %68 : vector<8x1xf32>
      %73 = arith.addf %72, %64 : vector<8x1xf32>
      %c0_53 = arith.constant 0 : index
      %c0_54 = arith.constant 0 : index
      %74 = vector.load %arg6[%c0_53, %c0_54] : memref<8x1xf32, #tpu.memory_space<vmem>>, vector<8x1xf32>
      tpu.vector_store %arg6[%c0_53, %c0_54], %73 {strides = array<i32>} : memref<8x1xf32, #tpu.memory_space<vmem>>, vector<8x1xf32>,
    } else {
    }
    return
  }
  func.func @transform_0(%arg0: i32, %arg1: i32) -> (i32, i32) {
    %c0_i32 = arith.constant 0 : i32
    %c0_i32_0 = arith.constant 0 : i32
    return %arg0, %c0_i32 : i32, i32
  }
  func.func @transform_1(%arg0: i32, %arg1: i32) -> (i32, i32) {
    %c0_i32 = arith.constant 0 : i32
    %c0_i32_0 = arith.constant 0 : i32
    return %c0_i32, %arg1 : i32, i32
  }
  func.func @transform_2(%arg0: i32, %arg1: i32) -> (i32, i32) {
    %c0_i32 = arith.constant 0 : i32
    %c0_i32_0 = arith.constant 0 : i32
    return %c0_i32, %arg1 : i32, i32
  }
  func.func @transform_3(%arg0: i32, %arg1: i32) -> (i32, i32) {
    %c0_i32 = arith.constant 0 : i32
    return %arg0, %arg1 : i32, i32
  }
  func.func @transform_4(%arg0: i32, %arg1: i32) -> (i32, i32) {
    %c0_i32 = arith.constant 0 : i32
    %c0_i32_0 = arith.constant 0 : i32
    return %arg0, %c0_i32 : i32, i32
  }
}

</mosaic_0001>

<bundles_post_ra>
// kernel: tpu_custom_call.1
= control target key start
LH: loop header
LB: loop body
LE: loop exit
PB: predicated region body
PF: predicated region fallthrough
CT: control target
= control target key end

     0   :  { %10 = vsyncpa [#allocation8], 0  ;;  %s452_s0 = inlined_call_operand.hbm [shape: bf16[8,32], index: 0, kind: input, shape index: {}]   ;;  %s453_s1 = inlined_call_operand.hbm [shape: bf16[32,32], index: 1, kind: input, shape index: {}]   ;;  %s454_s2 = inlined_call_operand.vmem [shape: f32[1,32], index: 2, kind: input, shape index: {}]   ;;  %s455_s3 = inlined_call_operand.hbm [shape: f32[8,16], index: 3, kind: output, shape index: {0}]   ;;  %s456_s4 = inlined_call_operand.vmem [shape: f32[8,1], index: 4, kind: output, shape index: {1}]  }
   0x1   :  { %11 = vsyncpa [#allocation11], 0 }
   0x2   :  { %12 = vsyncpa [#allocation9], 0  ;;  %s351_s15 = smov [#allocation7]   ;;  %s352_s17 = smov [#allocation10]  }
   0x3   :  { %s19_s16 = sshll.u32 %s351_s15, 4  ;;  %s28_s18 = sshll.u32 %s352_s17, 4  ;;  %s20_s16 = int_to_ptr.vmem [resolvable:$true] %s19_s16  ;;  %s387_s18 = int_to_ptr.vmem [resolvable:$true] %s28_s18 }
   0x4   :  { %s279_s21 = scalar_lea.hbm %s452_s0, 64 }
   0x5   :  { %p280_p0 = scmp.ne.s32.totalorder %s452_s0, %s279_s21  ;;  %p283_p1 = scmp.lt.u32.totalorder %s279_s21, %s452_s0 }
   0x7   :  { %p285_p2 = pnand %p283_p1, %p280_p0 }
   0x9   :  { %288 = shalt.err (!%p285_p2)
}
   0xa   :  { %s289_s26 = scalar_lea.vmem %s20_s16, 64  ;;  %p294_p4 = scmp.lt.s32.totalorder %s20_s16, %s20_s16 }
   0xb   :  { %p290_p3 = scmp.ne.s32.totalorder %s20_s16, %s289_s26  ;;  %p295_p5 = scmp.lt.s32.totalorder %s289_s26, %s289_s26 }
   0xd   :  { %p296_p6 = por %p295_p5, %p294_p4 }
   0xf   :  { %p297_p7 = pnand %p296_p6, %p290_p3 }
  0x11   :  { %300 = shalt.err (!%p297_p7)
}
  0x12   :  { %22 = dma.hbm_to_vmem [thread:$0]  %s452_s0, 64, %s20_s16, [#allocation8]  }
  0x13   :  { %s301_s5 = scalar_lea.hbm %s453_s1, 256 }
  0x14   :  { %p302_p8 = scmp.ne.s32.totalorder %s453_s1, %s301_s5  ;;  %p305_p9 = scmp.lt.u32.totalorder %s301_s5, %s453_s1 }
  0x16   :  { %p307_p10 = pnand %p305_p9, %p302_p8 }
  0x18   :  { %310 = shalt.err (!%p307_p10)
}
  0x19   :  { %s311_s10 = scalar_lea.vmem %s387_s18, 256  ;;  %p316_p12 = scmp.lt.s32.totalorder %s387_s18, %s387_s18 }
  0x1a   :  { %p312_p11 = scmp.ne.s32.totalorder %s387_s18, %s311_s10  ;;  %p317_p13 = scmp.lt.s32.totalorder %s311_s10, %s311_s10 }
  0x1c   :  { %p318_p0 = por %p317_p13, %p316_p12 }
  0x1e   :  { %p319_p1 = pnand %p318_p0, %p312_p11 }
  0x20   :  { %322 = shalt.err (!%p319_p1)
}
  0x21   :  { %s353_s0 = smov 64   ;;  %s354_s11 = smov 4  }
  0x22   :  { %34 = dma.hbm_to_vmem [thread:$0]  %s453_s1, 256, %s387_s18, [#allocation11], %s353_s0, %s353_s0, %s354_s11  }
  0x23   :  { %345 = dma.done.wait [#allocation8], 64  }
  0x24   :  { %346 = vsyncadd [#allocation8], 4294967232 }
  0x25   :  { %347 = dma.done.wait [#allocation11], 256  }
  0x26   :  { %348 = vsyncadd [#allocation11], 4294967040  ;;  %v355_v0 = vmov 0.0   ;;  %vm356_vm0 = vmmov 0   ;;  %v263_v1 = vld [vmem:[#allocation10] sm:$0xff]   ;;  %v264_v2 = vld [vmem:[#allocation10 + $0x8] sm:$0xff]  }
  0x27   :  { %242 = vmatprep.subr.bf16.mxu0 %v355_v0  ;;  %246 = vmatprep.mubr.msk.bf16.mxu0 %vm356_vm0, %v355_v0  ;;  %v54_v3 = vld [vmem:[#allocation7] sm:$0xf]  ;;  %vm78_vm1 = vcmask 261120   ;;  %vm48_vm2 = vcmask 7168   ;;  %v357_v4 = vmov -inf   ;;  %vm122_vm3 = vcmask 130048  }
  0x28   :  { %243 = vmatpush3.bf16.msra.mxu0 %v263_v1  ;;  %50 = vst.msk [vmem:[#allocation4] sm:$0xff] %vm48_vm2, %v357_v4  ;;  %49 = vst.msk [vmem:[#allocation2] sm:$0xff] %vm48_vm2, %v357_v4  ;;  %v235_v5 = vld [vmem:[%s454_s2] ss:$0 sm:$0xff]  ;;  %vm151_vm4 = vcmask 261248   ;;  %v358_v14 = vmov 0  }
  0x29   :  { %244 = vmatprep.subr.bf16.mxu0 %v355_v0  ;;  %51 = vst.msk [vmem:[#allocation3] sm:$0xff] %vm48_vm2, %v355_v0  ;;  %52 = vst.msk [vmem:[#allocation5] sm:$0xff] %vm48_vm2, %v355_v0  ;;  %261 = vset.pattern.permute.xlu1 %v358_v14  ;;  %s359_s2 = smov 16   ;;  %s360_s15 = smov 112  }
  0x2a   :  { %53 = vst.msk [vmem:[#allocation6] sm:$0xff] %vm48_vm2, %v355_v0  ;;  %262 = vset.pattern.permute.xlu0 %v358_v14  ;;  %s361_s16 = smov [#allocation12]  }
  0x2b   :  { %s221_s17 = sshll.u32 %s361_s16, 4  ;;  %s222_s17 = int_to_ptr.vmem [resolvable:$true] %s221_s17 }
  0x2c   :  { %245 = vmatpush3.bf16.msra.mxu0 %v264_v2  ;;  %s323_s18 = scalar_lea.vmem %s222_s17, 128  ;;  %p328_p3 = scmp.lt.s32.totalorder %s222_s17, %s222_s17 }
  0x2d   :  { %p324_p2 = scmp.ne.s32.totalorder %s222_s17, %s323_s18  ;;  %p329_p4 = scmp.lt.s32.totalorder %s323_s18, %s323_s18 }
  0x2f   :  { %247 = vmatmul.mubr.msk.bf16.vlgmr.msra.gmra.mrb[0].mxu0 %vm78_vm1, %v54_v3  ;;  %v150_v15 = vld [vmem:[#allocation4] sm:$0xff]  ;;  %v125_v18 = vld [vmem:[#allocation2] sm:$0xff]  ;;  %p330_p5 = por %p329_p4, %p328_p3 }
  0x30   :  { %v130_v41 = vld [vmem:[#allocation3] sm:$0xff] }
  0x31   :  { %p331_p6 = pnand %p330_p5, %p324_p2 }
 0x102   :  { %v116_v6 = vpop.f32.mrb[0].mxu0 }
 0x103   :  { %v117_v7 = vadd.f32 %v235_v5, %v116_v6  ;;  %v248_v8 = vpop.f32.mrb[1].mxu0 }
 0x104   :  { %v119_v9 = vpop.f32.mrb[2].mxu0 }
 0x105   :  { %v124_v10 = vmul.f32 0.5, %v117_v7  ;;  %v249_v11 = vpop.f32.mrb[3].mxu0  ;;  %123 = vst.msk [vmem:[#allocation12] sm:$0xff] %vm122_vm3, %v117_v7 }
 0x107   :  { %v152_v12 = vsel %vm151_vm4, %v124_v10, -inf  ;;  %v126_v13 = vsel %vm122_vm3, %v124_v10, -inf }
 0x108   :  { %153 = vmax.xlane.f32.xlu0 %v152_v12 }
 0x10c   :  { %127 = vmax.xlane.f32.xlu0 %v126_v13 }
 0x195   :  { %v154_v16 = vpop.xlane.xlu0 %153 }
 0x196   :  { %v155_v17 = vmax.f32 %v150_v15, %v154_v16 }
 0x198   :  { %v156_v19 = vsub.f32 %v150_v15, %v155_v17  ;;  %195 = vst.msk [vmem:[#allocation4] sm:$0xff] %vm48_vm2, %v155_v17  ;;  %161 = vperm.xlu1 %261, %v155_v17  }
 0x199   :  { %v128_v20 = vpop.xlane.xlu0 %127 }
 0x19a   :  { %v129_v21 = vmax.f32 %v125_v18, %v128_v20 }
 0x19c   :  { %v131_v22 = vsub.f32 %v125_v18, %v129_v21  ;;  %149 = vst.msk [vmem:[#allocation2] sm:$0xff] %vm48_vm2, %v129_v21  ;;  %181 = vrot.lane.b32.xlu1 %v124_v10, %s359_s2  ;;  %137 = vperm.xlu0 %262, %v129_v21  }
 0x19e   :  { %v132_v39 = vmul.f32 1.442695, %v131_v22 }
 0x217   :  { %v162_v23 = vpop.permute.xlu1 %161 }
 0x218   :  { %v164_v24 = vsub.f32 %v124_v10, %v162_v23 }
 0x21a   :  { %v165_v25 = vmul.f32 1.442695, %v164_v24 }
 0x21b   :  { %v138_v26 = vpop.permute.xlu0 %137  ;;  %v182_v29 = vpop.permute.xlu1 %181 }
 0x21c   :  { %265 = vpow2.f32 %v165_v25  ;;  %v140_v27 = vsub.f32 %v124_v10, %v138_v26  ;;  %v184_v31 = vsub.f32 %v124_v10, %v182_v29 }
 0x21e   :  { %v141_v28 = vmul.f32 1.442695, %v140_v27 }
 0x220   :  { %267 = vpow2.f32 %v141_v28 }
 0x221   :  { %269 = vpow2.f32 %v132_v39 }
 0x226   :  { %v266_v30 = vpop.eup %265 }
 0x227   :  { %170 = vrot.lane.b32.xlu1 %v266_v30, %s360_s15  ;;  %v185_v32 = vmul.f32 %v266_v30, %v184_v31 }
 0x22a   :  { %v268_v33 = vpop.eup %267 }
 0x22b   :  { %187 = vrot.lane.b32.xlu1 %v185_v32, %s360_s15  ;;  %v143_v34 = vsel %vm122_vm3, %v268_v33, 0.0  ;;  %v270_v40 = vpop.eup %269 }
 0x22c   :  { %144 = vadd.xlane.f32.xlu0 %v143_v34  ;;  %v134_v42 = vmul.f32 %v270_v40, %v130_v41 }
 0x299   :  { %v171_v35 = vpop.permute.xlu1 %170 }
 0x29a   :  { %v173_v36 = vsel %vm122_vm3, %v171_v35, 0.0 }
 0x29b   :  { %174 = vadd.xlane.f32.xlu1 %v173_v36 }
 0x29d   :  { %v188_v37 = vpop.permute.xlu1 %187 }
 0x29e   :  { %v190_v38 = vsel %vm122_vm3, %v188_v37, 0.0 }
 0x29f   :  { %191 = vadd.xlane.f32.xlu1 %v190_v38 }
 0x2b9   :  { %v145_v43 = vpop.xlane.xlu0 %144 }
 0x2ba   :  { %v146_v44 = vadd.f32 %v145_v43, %v134_v42 }
 0x2bc   :  { %148 = vst.msk [vmem:[#allocation3] sm:$0xff] %vm48_vm2, %v146_v44 }
 0x2bd   :  { %334 = shalt.err (!%p331_p6)
}
 0x2be   :  { %s335_s21 = scalar_lea.hbm %s455_s3, 128 }
 0x2bf   :  { %p336_p7 = scmp.ne.s32.totalorder %s455_s3, %s335_s21  ;;  %p339_p8 = scmp.lt.u32.totalorder %s335_s21, %s455_s3 }
 0x2c1   :  { %p341_p9 = pnand %p339_p8, %p336_p7 }
 0x2c3   :  { %344 = shalt.err (!%p341_p9)
}
 0x2c4   :  { %224 = dma.vmem_to_hbm [thread:$0]  %s222_s17, 128, %s455_s3, [#allocation9]   ;;  %v157_v45 = vmul.f32 1.442695, %v156_v19  ;;  %v167_v47 = vld [vmem:[#allocation5] sm:$0xff]  ;;  %v178_v50 = vld [vmem:[#allocation6] sm:$0xff] }
 0x2c5   :  { %v200_v55 = vld [vmem:[#allocation3] sm:$0xff]  ;;  %v204_v62 = vld [vmem:[#allocation4] sm:$0xff]  ;;  %v199_v2 = vld [vmem:[#allocation2] sm:$0xff] }
 0x2c6   :  { %271 = vpow2.f32 %v157_v45 }
 0x2c7   :  { %273 = vlog2.f32 %v200_v55 }
 0x2d0   :  { %v272_v46 = vpop.eup %271 }
 0x2d1   :  { %v168_v48 = vmul.f32 %v272_v46, %v167_v47  ;;  %v179_v52 = vmul.f32 %v272_v46, %v178_v50  ;;  %v274_v57 = vpop.eup %273 }
 0x2d2   :  { %v202_v60 = vmul.f32 0.6931472, %v274_v57 }
 0x2d4   :  { %v203_v3 = vadd.f32 %v202_v60, %v199_v2 }
 0x328   :  { %v175_v49 = vpop.xlane.xlu1 %174 }
 0x329   :  { %v176_v51 = vadd.f32 %v175_v49, %v168_v48 }
 0x32b   :  { %177 = vst.msk [vmem:[#allocation5] sm:$0xff] %vm48_vm2, %v176_v51 }
 0x32c   :  { %v192_v53 = vpop.xlane.xlu1 %191 }
 0x32d   :  { %v193_v54 = vadd.f32 %v192_v53, %v179_v52 }
 0x32f   :  { %194 = vst.msk [vmem:[#allocation6] sm:$0xff] %vm48_vm2, %v193_v54 }
 0x332   :  { %v205_v56 = vld [vmem:[#allocation5] sm:$0xff] }
 0x333   :  { %275 = vlog2.f32 %v205_v56 }
 0x334   :  { %277 = vrcp.f32 %v205_v56 }
 0x336   :  { %v209_v63 = vld [vmem:[#allocation6] sm:$0xff] }
 0x33d   :  { %v276_v58 = vpop.eup %275 }
 0x33e   :  { %v278_v59 = vpop.eup %277  ;;  %v207_v61 = vmul.f32 0.6931472, %v276_v58 }
 0x33f   :  { %v211_v1 = vmul.f32 %v278_v59, %v209_v63 }
 0x340   :  { %v208_v0 = vadd.f32 %v207_v61, %v204_v62 }
 0x342   :  { %v212_v4 = vsub.f32 %v211_v1, %v208_v0 }
 0x344   :  { %v213_v5 = vadd.f32 %v212_v4, %v203_v3 }
 0x346   :  { %214 = vst.msk [vmem:[%s456_s4] sm:$0xff] %vm48_vm2, %v213_v5 }
 0x347   :  { %349 = dma.done.wait [#allocation9], 128  }
 0x348   :  { %350 = vsyncadd [#allocation9], 4294967168 }
 0x349   :  { %232 = vsyncpa [#allocation8], 1 }
 0x34a   :  { %233 = vsyncpa [#allocation11], 1 }
 0x34b   :  { %234 = vsyncpa [#allocation9], 1 }

</bundles_post_ra>
